<compile_context>
chip_gen: v7x
topology: tpu7x:2x2x1
jax: 0.10.0
libtpu: 0.0.40
codegen_flags: <defaults>
</compile_context>

<pallas_src>
import functools

import jax
import jax.numpy as jnp
from jax.experimental import pallas as pl
from jax.experimental.pallas import tpu as pltpu

_EPS = 1e-5


# ----------------------------------------------------------------------------
# Pallas kernel
# ----------------------------------------------------------------------------
def _layernorm_kernel(x_ref, w_ref, b_ref, o_ref, *, groups, chans):
    # x_ref / o_ref: (bt, groups*chans, tw) -- channels on sublanes, spatial on
    # lanes. w_ref / b_ref: (groups*chans, 1), resident across the grid.
    w = w_ref[...].astype(jnp.float32)
    b = b_ref[...].astype(jnp.float32)
    for g in range(groups):                               # static, tiny loop
        lo, hi = g * chans, (g + 1) * chans
        xg = x_ref[:, lo:hi, :].astype(jnp.float32)       # (bt, chans, tw)
        mu = jnp.mean(xg, axis=1, keepdims=True)          # sublane (XLU) reduce
        xc = xg - mu
        var = jnp.mean(xc * xc, axis=1, keepdims=True)    # biased variance
        inv = jax.lax.rsqrt(var + _EPS)                   # EUP rsqrt
        yg = xc * inv * w[lo:hi, :] + b[lo:hi, :]
        o_ref[:, lo:hi, :] = yg.astype(o_ref.dtype)


# ----------------------------------------------------------------------------
# Tiling heuristics
# ----------------------------------------------------------------------------
def _largest_divisor_leq(n, k):
    k = max(1, min(n, k))
    while n % k:
        k -= 1
    return k


def _choose_blocks(bp, cp, hw, itemsize, target_bytes=4 << 20):
    """Pick (bt, tw) so one input block is ~target_bytes, blocks divide the
    array, and the grid has >= 2 steps when possible (v7x megacore)."""
    if hw % 128 != 0:
        tw = hw  # full extent is always a legal block dim (masked lanes)
    else:
        max_tw = max(128, (target_bytes // max(cp * itemsize, 1)) // 128 * 128)
        tw = hw
        while tw > max_tw and tw % 256 == 0:
            tw //= 2
    row_bytes = cp * tw * itemsize
    bt = _largest_divisor_leq(bp, max(1, target_bytes // max(row_bytes, 1)))
    # Guarantee >= 2 balanced parallel grid steps so both v7x TCs get work.
    if (bp // bt) * (hw // tw) < 2:
        if bp >= 2:
            bt = _largest_divisor_leq(bp, bp // 2)
        elif hw % 256 == 0:
            tw = hw // 2
    return bt, tw


# ----------------------------------------------------------------------------
# Wrapper
# ----------------------------------------------------------------------------
def layernorm_nchw(x, weight, bias):
    """LayerNorm over the channel dim of an NCHW tensor (ReFusion semantics)."""
    B, C, H, W = x.shape
    HW = H * W
    itemsize = jnp.dtype(x.dtype).itemsize

    x3 = x.reshape(B, C, HW)                      # free contiguous view

    # Pack G batch rows onto the sublane axis when C under-fills a vreg tile.
    pack = (8 * 4) // itemsize                    # 8 for f32, 16 for bf16
    if C < pack and pack % C == 0 and B % (pack // C) == 0:
        G = pack // C
    else:
        G = 1
    Bp, Cp = B // G, G * C
    x3 = x3.reshape(Bp, Cp, HW)                   # still a free view

    w2 = jnp.tile(weight.reshape(C, 1), (G, 1))   # (Cp, 1)
    b2 = jnp.tile(bias.reshape(C, 1), (G, 1))

    bt, tw = _choose_blocks(Bp, Cp, HW, itemsize)
    grid = (Bp // bt, HW // tw)

    block_bytes = bt * Cp * tw * itemsize
    # in + out, double-buffered, plus headroom; also lifts v5e's 16 MiB default.
    vmem_limit = int(max(32 << 20, 4 * block_bytes + (2 << 20)))

    out = pl.pallas_call(
        functools.partial(_layernorm_kernel, groups=G, chans=C),
        out_shape=jax.ShapeDtypeStruct((Bp, Cp, HW), x.dtype),
        grid=grid,
        in_specs=[
            pl.BlockSpec((bt, Cp, tw), lambda i, j: (i, 0, j)),
            pl.BlockSpec((Cp, 1), lambda i, j: (0, 0)),
            pl.BlockSpec((Cp, 1), lambda i, j: (0, 0)),
        ],
        out_specs=pl.BlockSpec((bt, Cp, tw), lambda i, j: (i, 0, j)),
        compiler_params=pltpu.CompilerParams(
            dimension_semantics=("parallel", "parallel"),
            vmem_limit_bytes=vmem_limit),
    )(x3, w2, b2)

    return out.reshape(B, C, H, W)


# Pure-JAX reference (mirrors the PyTorch forward exactly) for a sanity check.
def _layernorm_ref(x, weight, bias):
    B, C, H, W = x.shape
    x3 = x.reshape(B, C, H * W).transpose(0, 2, 1)            # (B, HW, C)
    mu = jnp.mean(x3, axis=-1, keepdims=True)
    var = jnp.var(x3, axis=-1, keepdims=True)                 # unbiased=False
    y = (x3 - mu) / jnp.sqrt(var + _EPS) * weight + bias
    return y.transpose(0, 2, 1).reshape(B, C, H, W)


# ----------------------------------------------------------------------------
# Main
# ----------------------------------------------------------------------------
if __name__ == "__main__":
    B, C, H, W = 2, 4, 16, 16

    key = jax.random.PRNGKey(0)
    x = jax.random.normal(key, (B, C, H, W), jnp.float32)

    # Module init: weight = ones(dim), bias = zeros(dim)
    weight = jnp.ones((C,), jnp.float32)
    bias = jnp.zeros((C,), jnp.float32)

    fwd = jax.jit(layernorm_nchw)
    out = fwd(x, weight, bias)
    out = jax.block_until_ready(out)

    assert out.shape == (B, C, H, W), out.shape
    assert out.dtype == x.dtype, out.dtype
    assert jnp.all(jnp.isfinite(out))

    ref = _layernorm_ref(x, weight, bias)
    assert jnp.allclose(out, ref, atol=1e-5, rtol=1e-5), float(
        jnp.max(jnp.abs(out - ref)))

    print("KERNEL_OK")
</pallas_src>

<mosaic_0001>
module attributes {stable_mosaic.version = 11 : i64} {
  func.func @_layernorm_kernel(%arg0: i32, %arg1: i32, %arg2: memref<1x8x128xf32, #tpu.memory_space<vmem>>, %arg3: memref<8x1xf32, #tpu.memory_space<vmem>>, %arg4: memref<8x1xf32, #tpu.memory_space<vmem>>, %arg5: memref<1x8x128xf32, #tpu.memory_space<vmem>>) attributes {dimension_semantics = [#tpu.dimension_semantics<parallel>, #tpu.dimension_semantics<parallel>], iteration_bounds = array<i64: 1, 2>, scalar_prefetch = 0 : i64, scratch_operands = 0 : i64, tpu.core_type = #tpu.core_type<tc>, window_params = [{transform_indices = @transform_0, window_bounds = array<i64: 1, 8, 128>}, {pipeline_mode = #tpu.pipeline_mode<synchronous>, transform_indices = @transform_1, window_bounds = array<i64: 8, 1>}, {pipeline_mode = #tpu.pipeline_mode<synchronous>, transform_indices = @transform_2, window_bounds = array<i64: 8, 1>}, {transform_indices = @transform_3, window_bounds = array<i64: 1, 8, 128>}]} {
    %c0 = arith.constant 0 : index
    %c0_0 = arith.constant 0 : index
    %0 = vector.load %arg3[%c0, %c0_0] : memref<8x1xf32, #tpu.memory_space<vmem>>, vector<8x1xf32>
    %c0_1 = arith.constant 0 : index
    %c0_2 = arith.constant 0 : index
    %1 = vector.load %arg4[%c0_1, %c0_2] : memref<8x1xf32, #tpu.memory_space<vmem>>, vector<8x1xf32>
    %c0_3 = arith.constant 0 : index
    %c0_4 = arith.constant 0 : index
    %c0_5 = arith.constant 0 : index
    %2 = vector.load %arg2[%c0_3, %c0_4, %c0_5] : memref<1x8x128xf32, #tpu.memory_space<vmem>>, vector<1x4x128xf32>
    %cst = arith.constant dense<0.000000e+00> : vector<1x128xf32>
    %3 = vector.multi_reduction <add>, %2, %cst [1] : vector<1x4x128xf32> to vector<1x128xf32>
    %4 = vector.shape_cast %3 : vector<1x128xf32> to vector<1x1x128xf32>
    %cst_6 = arith.constant 4.000000e+00 : f32
    %5 = vector.broadcast %cst_6 : f32 to vector<1x1x128xf32>
    %6 = arith.divf %4, %5 : vector<1x1x128xf32>
    %7 = vector.broadcast %6 : vector<1x1x128xf32> to vector<1x4x128xf32>
    %8 = arith.subf %2, %7 : vector<1x4x128xf32>
    %9 = arith.mulf %8, %8 : vector<1x4x128xf32>
    %cst_7 = arith.constant dense<0.000000e+00> : vector<1x128xf32>
    %10 = vector.multi_reduction <add>, %9, %cst_7 [1] : vector<1x4x128xf32> to vector<1x128xf32>
    %11 = vector.shape_cast %10 : vector<1x128xf32> to vector<1x1x128xf32>
    %cst_8 = arith.constant 4.000000e+00 : f32
    %12 = vector.broadcast %cst_8 : f32 to vector<1x1x128xf32>
    %13 = arith.divf %11, %12 : vector<1x1x128xf32>
    %cst_9 = arith.constant 9.99999974E-6 : f32
    %14 = vector.broadcast %cst_9 : f32 to vector<1x1x128xf32>
    %15 = arith.addf %13, %14 : vector<1x1x128xf32>
    %16 = math.rsqrt %15 : vector<1x1x128xf32>
    %17 = vector.broadcast %16 : vector<1x1x128xf32> to vector<1x4x128xf32>
    %18 = arith.mulf %8, %17 : vector<1x4x128xf32>
    %19 = vector.extract_strided_slice %0 {offsets = [0, 0], sizes = [4, 1], strides = [1, 1]} : vector<8x1xf32> to vector<4x1xf32>
    %20 = vector.shape_cast %19 : vector<4x1xf32> to vector<1x4x1xf32>
    %21 = vector.broadcast %20 : vector<1x4x1xf32> to vector<1x4x128xf32>
    %22 = arith.mulf %18, %21 : vector<1x4x128xf32>
    %23 = vector.extract_strided_slice %1 {offsets = [0, 0], sizes = [4, 1], strides = [1, 1]} : vector<8x1xf32> to vector<4x1xf32>
    %24 = vector.shape_cast %23 : vector<4x1xf32> to vector<1x4x1xf32>
    %25 = vector.broadcast %24 : vector<1x4x1xf32> to vector<1x4x128xf32>
    %26 = arith.addf %22, %25 : vector<1x4x128xf32>
    %c0_10 = arith.constant 0 : index
    %c0_11 = arith.constant 0 : index
    %c0_12 = arith.constant 0 : index
    %27 = vector.load %arg5[%c0_10, %c0_11, %c0_12] : memref<1x8x128xf32, #tpu.memory_space<vmem>>, vector<1x4x128xf32>
    tpu.vector_store %arg5[%c0_10, %c0_11, %c0_12], %26 {strides = array<i32>} : memref<1x8x128xf32, #tpu.memory_space<vmem>>, vector<1x4x128xf32>,
    %c0_13 = arith.constant 0 : index
    %c4 = arith.constant 4 : index
    %c0_14 = arith.constant 0 : index
    %28 = vector.load %arg2[%c0_13, %c4, %c0_14] : memref<1x8x128xf32, #tpu.memory_space<vmem>>, vector<1x4x128xf32>
    %cst_15 = arith.constant dense<0.000000e+00> : vector<1x128xf32>
    %29 = vector.multi_reduction <add>, %28, %cst_15 [1] : vector<1x4x128xf32> to vector<1x128xf32>
    %30 = vector.shape_cast %29 : vector<1x128xf32> to vector<1x1x128xf32>
    %cst_16 = arith.constant 4.000000e+00 : f32
    %31 = vector.broadcast %cst_16 : f32 to vector<1x1x128xf32>
    %32 = arith.divf %30, %31 : vector<1x1x128xf32>
    %33 = vector.broadcast %32 : vector<1x1x128xf32> to vector<1x4x128xf32>
    %34 = arith.subf %28, %33 : vector<1x4x128xf32>
    %35 = arith.mulf %34, %34 : vector<1x4x128xf32>
    %cst_17 = arith.constant dense<0.000000e+00> : vector<1x128xf32>
    %36 = vector.multi_reduction <add>, %35, %cst_17 [1] : vector<1x4x128xf32> to vector<1x128xf32>
    %37 = vector.shape_cast %36 : vector<1x128xf32> to vector<1x1x128xf32>
    %cst_18 = arith.constant 4.000000e+00 : f32
    %38 = vector.broadcast %cst_18 : f32 to vector<1x1x128xf32>
    %39 = arith.divf %37, %38 : vector<1x1x128xf32>
    %cst_19 = arith.constant 9.99999974E-6 : f32
    %40 = vector.broadcast %cst_19 : f32 to vector<1x1x128xf32>
    %41 = arith.addf %39, %40 : vector<1x1x128xf32>
    %42 = math.rsqrt %41 : vector<1x1x128xf32>
    %43 = vector.broadcast %42 : vector<1x1x128xf32> to vector<1x4x128xf32>
    %44 = arith.mulf %34, %43 : vector<1x4x128xf32>
    %45 = vector.extract_strided_slice %0 {offsets = [4, 0], sizes = [4, 1], strides = [1, 1]} : vector<8x1xf32> to vector<4x1xf32>
    %46 = vector.shape_cast %45 : vector<4x1xf32> to vector<1x4x1xf32>
    %47 = vector.broadcast %46 : vector<1x4x1xf32> to vector<1x4x128xf32>
    %48 = arith.mulf %44, %47 : vector<1x4x128xf32>
    %49 = vector.extract_strided_slice %1 {offsets = [4, 0], sizes = [4, 1], strides = [1, 1]} : vector<8x1xf32> to vector<4x1xf32>
    %50 = vector.shape_cast %49 : vector<4x1xf32> to vector<1x4x1xf32>
    %51 = vector.broadcast %50 : vector<1x4x1xf32> to vector<1x4x128xf32>
    %52 = arith.addf %48, %51 : vector<1x4x128xf32>
    %c0_20 = arith.constant 0 : index
    %c4_21 = arith.constant 4 : index
    %c0_22 = arith.constant 0 : index
    %53 = vector.load %arg5[%c0_20, %c4_21, %c0_22] : memref<1x8x128xf32, #tpu.memory_space<vmem>>, vector<1x4x128xf32>
    tpu.vector_store %arg5[%c0_20, %c4_21, %c0_22], %52 {strides = array<i32>} : memref<1x8x128xf32, #tpu.memory_space<vmem>>, vector<1x4x128xf32>,
    return
  }
  func.func @transform_0(%arg0: i32, %arg1: i32) -> (i32, i32, i32) {
    %c0_i32 = arith.constant 0 : i32
    %c0_i32_0 = arith.constant 0 : i32
    return %arg0, %c0_i32, %arg1 : i32, i32, i32
  }
  func.func @transform_1(%arg0: i32, %arg1: i32) -> (i32, i32) {
    %c0_i32 = arith.constant 0 : i32
    %c0_i32_0 = arith.constant 0 : i32
    %c0_i32_1 = arith.constant 0 : i32
    return %c0_i32, %c0_i32_0 : i32, i32
  }
  func.func @transform_2(%arg0: i32, %arg1: i32) -> (i32, i32) {
    %c0_i32 = arith.constant 0 : i32
    %c0_i32_0 = arith.constant 0 : i32
    %c0_i32_1 = arith.constant 0 : i32
    return %c0_i32, %c0_i32_0 : i32, i32
  }
  func.func @transform_3(%arg0: i32, %arg1: i32) -> (i32, i32, i32) {
    %c0_i32 = arith.constant 0 : i32
    %c0_i32_0 = arith.constant 0 : i32
    return %arg0, %c0_i32, %arg1 : i32, i32, i32
  }
}

</mosaic_0001>

<bundles_post_ra>
// kernel: layernorm_nchw.1
= control target key start
LH: loop header
LB: loop body
LE: loop exit
PB: predicated region body
PF: predicated region fallthrough
CT: control target
= control target key end

     0   :  { %s437_s12 = smov 0   ;;  %s439_s13 = smov 0   ;;  %s487_s0 = inlined_call_operand.vmem [shape: f32[1,8,256], index: 0, kind: input, shape index: {}]   ;;  %s488_s1 = inlined_call_operand.vmem [shape: f32[8,1], index: 1, kind: input, shape index: {}]   ;;  %s489_s2 = inlined_call_operand.vmem [shape: f32[8,1], index: 2, kind: input, shape index: {}]   ;;  %s490_s3 = inlined_call_operand.vmem [shape: f32[1,8,256], index: 3, kind: output, shape index: {}]  }
   0x1   :  { %s441_s14 = smov 0  }
   0x2 LB: > { %s22_s15 = sadd.s32 1, %s410_s13  ;;  %p357_p0 = scmp.ge.s32.totalorder %s414_s14, 1  ;;  %s414_s14 = sphi %s441_s14, %s13_s14   ;;  %s410_s13 = sphi %s439_s13, %s492_s13   ;;  %s406_s12 = sphi %s437_s12, %s491_s12  }
   0x3   : > { %p23_p1 = scmp.ge.s32.totalorder %s22_s15, 2  ;;  %p156_p2 = scmp.lt.s32.totalorder %s414_s14, 3 }
   0x5   : > { %s494_s15 = smov (%p23_p1, %s22_s15), 0  ;;  %p157_p3 = pnand %p357_p0, %p156_p2 }
   0x6   : > { %v202_v0 = vld [vmem:[%s488_s1] sm:$0xff] (!%p157_p3)  ;;  %v416_v1 = vmov (!%p157_p3), 0   ;;  %p188_p4 = scmp.lt.s32.totalorder (!%p157_p3), %s406_s12, 1  ;;  %vm205_vm0 = vcmask (!%p157_p3), 1043456  }
   0x7   : > { %160 = sbr.rel (%p157_p3) target bundleno = 145 (0x91), region = 32  ;;  %387 = vset.pattern.permute.xlu0 (!%p157_p3), %v416_v1  ;;  %v203_v2 = vld [vmem:[%s489_s2] sm:$0xff] (!%p157_p3) }
   0x8   : > { %230 = vperm.xlu0 (!%p157_p3), %387, %v202_v0  }
   0xc   : > { %236 = vperm.xlu0 (!%p157_p3), %387, %v203_v2  }
   0xe   : > { %s496_s12 = smov (!%p188_p4, %s406_s12), 1 }
   0xf   : > { %s358_s20 = sshll.u32 %s496_s12, 3 }
  0x10   : > { %s193_s23 = scalar_lea.vmem %s487_s0, %s358_s20  ;;  %s201_s26 = scalar_lea.vmem %s490_s3, %s358_s20 }
  0x11   : > { %v204_v3 = vld [vmem:[%s193_s23] sm:$0xf]  ;;  %v241_v4 = vld [vmem:[%s193_s23 + $0x4] sm:$0xf] }
  0x12   : > { %v206_v5 = vsel %vm205_vm0, %v204_v3, 0.0  ;;  %v242_v6 = vsel %vm205_vm0, %v241_v4, 0.0 }
  0x13   : > { %v207_v7 = vrot.slane %v206_v5, 4  ;;  %v243_v8 = vrot.slane %v242_v6, 4 }
  0x15   : > { %v208_v9 = vadd.f32 %v207_v7, %v206_v5  ;;  %v244_v10 = vadd.f32 %v243_v8, %v242_v6 }
  0x17   : > { %v209_v11 = vrot.slane %v208_v9, 2  ;;  %v245_v12 = vrot.slane %v244_v10, 2 }
  0x19   : > { %v210_v13 = vadd.f32 %v209_v11, %v208_v9  ;;  %v246_v14 = vadd.f32 %v245_v12, %v244_v10 }
  0x1b   : > { %v211_v15 = vrot.slane %v210_v13, 1  ;;  %v247_v16 = vrot.slane %v246_v14, 1 }
  0x1d   : > { %v212_v17 = vadd.f32 %v211_v15, %v210_v13  ;;  %v248_v18 = vadd.f32 %v247_v16, %v246_v14 }
  0x1f   : > { %v214_v19 = vmul.f32 0.25, %v212_v17  ;;  %v249_v20 = vmul.f32 0.25, %v248_v18 }
  0x21   : > { %v215_v21 = vsub.f32 %v204_v3, %v214_v19  ;;  %v250_v22 = vsub.f32 %v241_v4, %v249_v20 }
  0x23   : > { %v216_v23 = vmul.f32 %v215_v21, %v215_v21  ;;  %v251_v24 = vmul.f32 %v250_v22, %v250_v22 }
  0x25   : > { %v217_v25 = vsel %vm205_vm0, %v216_v23, 0.0  ;;  %v252_v26 = vsel %vm205_vm0, %v251_v24, 0.0 }
  0x26   : > { %v218_v27 = vrot.slane %v217_v25, 4  ;;  %v253_v28 = vrot.slane %v252_v26, 4 }
  0x28   : > { %v219_v29 = vadd.f32 %v218_v27, %v217_v25  ;;  %v254_v30 = vadd.f32 %v253_v28, %v252_v26 }
  0x2a   : > { %v220_v31 = vrot.slane %v219_v29, 2  ;;  %v255_v32 = vrot.slane %v254_v30, 2 }
  0x2c   : > { %v221_v33 = vadd.f32 %v220_v31, %v219_v29  ;;  %v256_v34 = vadd.f32 %v255_v32, %v254_v30 }
  0x2e   : > { %v222_v35 = vrot.slane %v221_v33, 1  ;;  %v257_v36 = vrot.slane %v256_v34, 1 }
  0x30   : > { %v223_v37 = vadd.f32 %v222_v35, %v221_v33  ;;  %v258_v38 = vadd.f32 %v257_v36, %v256_v34 }
  0x32   : > { %v224_v39 = vmul.f32 0.25, %v223_v37  ;;  %v259_v40 = vmul.f32 0.25, %v258_v38 }
  0x34   : > { %v225_v41 = vadd.f32 1e-05, %v224_v39  ;;  %v260_v42 = vadd.f32 1e-05, %v259_v40 }
  0x36   : > { %388 = vrsqrt.f32 %v225_v41 }
  0x37   : > { %390 = vrsqrt.f32 %v260_v42 }
  0x40   : > { %v389_v43 = vpop.eup %388 }
  0x41   : > { %v391_v44 = vpop.eup %390  ;;  %v227_v45 = vmul.f32 %v389_v43, %v215_v21 }
  0x42   : > { %v262_v47 = vmul.f32 %v391_v44, %v250_v22 }
  0x87   : > { %v231_v46 = vpop.permute.xlu0 %230 }
  0x88   : > { %v263_v48 = vrot.slane %v231_v46, 4  ;;  %v233_v49 = vmul.f32 %v231_v46, %v227_v45 }
  0x8a   : > { %v265_v51 = vmul.f32 %v263_v48, %v262_v47 }
  0x8b   : > { %v237_v50 = vpop.permute.xlu0 %236 }
  0x8c   : > { %v239_v52 = vadd.f32 %v237_v50, %v233_v49  ;;  %v266_v53 = vrot.slane %v237_v50, 4 }
  0x8e   : > { %240 = vst [vmem:[%s201_s26] sm:$0xf] %v239_v52  ;;  %v268_v54 = vadd.f32 %v266_v53, %v265_v51 }
  0x90   : > { %269 = vst [vmem:[%s201_s26 + $0x4] sm:$0xf] %v268_v54 }
  0x91 PF: > { %s13_s14 = sadd.s32 1, %s414_s14   ;;  %s491_s12 = smov %s410_s13 }
  0x92   : > { %p10_p5 = scmp.ge.s32.totalorder %s13_s14, 4   ;;  %s492_s13 = smov %s494_s15 }
  0x94   :  { %12 = sbr.rel (!%p10_p5) target bundleno = 2 (0x2), region = 62 }

</bundles_post_ra>
